<compile_context>
chip_gen: v6e
topology: v6e:2x2x1
jax: 0.10.0
libtpu: 0.0.40
codegen_flags: <defaults>
</compile_context>

<pallas_src>
import math

import jax
import jax.numpy as jnp
from jax.experimental import pallas as pl
from jax.experimental.pallas import tpu as pltpu

LANE = 128      # vreg lane width
SUBLANE = 8     # vreg sublane count (f32)


def _cdiv(a, b):
    return (a + b - 1) // b


def _round_up(x, m):
    return _cdiv(x, m) * m


def _pad_to(a, shape):
    pads = [(0, t - s) for s, t in zip(a.shape, shape)]
    if all(p == (0, 0) for p in pads):
        return a
    return jnp.pad(a, pads)


def actor_kernel(x_ref, w1_ref, b1_ref, w2_ref, b2_ref, w3_ref, b3_ref, o_ref):
    """Whole 3-layer MLP for one batch tile; weights/biases are VMEM-resident.

    Dots run at the weights' dtype (bf16 default) with f32 accumulation on the
    MXU; bias-add / ReLU / tanh stay in f32 (v5e VPU/EUP have no bf16 path).
    """
    x = x_ref[...].astype(w1_ref.dtype)

    h = jnp.dot(x, w1_ref[...], preferred_element_type=jnp.float32) + b1_ref[...]
    h = jnp.maximum(h, 0.0)                                     # ReLU (f32)

    h = jnp.dot(h.astype(w2_ref.dtype), w2_ref[...],
                preferred_element_type=jnp.float32) + b2_ref[...]
    h = jnp.maximum(h, 0.0)                                     # ReLU (f32)

    h = jnp.dot(h.astype(w3_ref.dtype), w3_ref[...],
                preferred_element_type=jnp.float32) + b3_ref[...]
    o_ref[...] = jnp.tanh(h).astype(o_ref.dtype)                # tanh (f32)


def prepare_params(params, dot_dtype=jnp.bfloat16):
    """Pad hidden/output feature dims to multiples of 128 lanes and cast weight
    matrices to `dot_dtype` (bf16 default).  d_in is left unpadded; biases stay
    f32.  Returns (padded_params, d_out)."""
    w1, b1, w2, b2, w3, b3 = params
    d_in, h1 = w1.shape
    h2 = w2.shape[1]
    d_out = w3.shape[1]

    h1_p = _round_up(h1, LANE)        # 500 -> 512
    h2_p = _round_up(h2, LANE)        # 128 -> 128
    d_out_p = _round_up(d_out, LANE)  # 8 -> 128 (lane-dense output stores)

    padded = (
        _pad_to(w1, (d_in, h1_p)).astype(dot_dtype),
        _pad_to(b1, (1, h1_p)).astype(jnp.float32),
        _pad_to(w2, (h1_p, h2_p)).astype(dot_dtype),
        _pad_to(b2, (1, h2_p)).astype(jnp.float32),
        _pad_to(w3, (h2_p, d_out_p)).astype(dot_dtype),
        _pad_to(b3, (1, d_out_p)).astype(jnp.float32),
    )
    return padded, d_out


def _default_num_cores():
    """Best-effort TensorCore count per device (2 on v7x / megacore parts)."""
    try:
        return max(1, int(getattr(jax.devices()[0], "num_cores", 1) or 1))
    except Exception:
        return 1


def actor_forward(x, padded_params, d_out, *, max_batch_tile=512, num_cores=None):
    """x: [B, dim_observation + dim_action] f32 -> [B, dim_action] f32."""
    w1, b1, w2, b2, w3, b3 = padded_params
    B, d_in = x.shape
    assert d_in == w1.shape[0], "input feature dim must match W1"
    h1 = w1.shape[1]
    h2 = w2.shape[1]
    d_out_p = w3.shape[1]

    if num_cores is None:
        num_cores = _default_num_cores()

    # Adaptive batch tiling: (a) tiles <= max_batch_tile, (b) >= num_cores grid
    # steps on multi-TC chips when the batch is big enough to split, (c) padded
    # tail < 8 rows.  Small batches on single-TC v5e/v6e -> grid=1, one tile.
    n_steps = max(1, _cdiv(B, max_batch_tile))
    if num_cores > 1 and B >= 2 * SUBLANE * num_cores:
        n_steps = max(n_steps, num_cores)
    tb = _round_up(_cdiv(B, n_steps), SUBLANE)
    Bp = n_steps * tb

    xp = _pad_to(x, (Bp, d_in))   # row pad only; no column pad of x

    bytes_w = sum(a.size * a.dtype.itemsize for a in padded_params)
    cost = pl.CostEstimate(
        flops=2 * Bp * (d_in * h1 + h1 * h2 + h2 * d_out_p),
        transcendentals=Bp * d_out_p,
        bytes_accessed=xp.size * 4 + bytes_w + Bp * d_out_p * 4,
    )

    full = lambda i: (0, 0)  # weights/biases: same (VMEM-resident) block every step

    out = pl.pallas_call(
        actor_kernel,
        out_shape=jax.ShapeDtypeStruct((Bp, d_out_p), jnp.float32),
        grid=(n_steps,),
        in_specs=[
            pl.BlockSpec((tb, d_in), lambda i: (i, 0)),   # x batch tile (d_in = full dim)
            pl.BlockSpec((d_in, h1), full),               # W1
            pl.BlockSpec((1, h1), full),                  # b1
            pl.BlockSpec((h1, h2), full),                 # W2
            pl.BlockSpec((1, h2), full),                  # b2
            pl.BlockSpec((h2, d_out_p), full),            # W3
            pl.BlockSpec((1, d_out_p), full),             # b3
        ],
        out_specs=pl.BlockSpec((tb, d_out_p), lambda i: (i, 0)),
        compiler_params=pltpu.CompilerParams(
            dimension_semantics=("parallel",)),
        cost_estimate=cost,
    )(xp, w1, b1, w2, b2, w3, b3)

    return out[:B, :d_out]


def init_actor_params(key, dim_observation, dim_action):
    """Deterministic init mimicking PyTorch nn.Linear default (uniform +/- 1/sqrt(fan_in))."""
    d_in = dim_observation + dim_action
    dims = [(d_in, 500), (500, 128), (128, dim_action)]
    params = []
    for (fan_in, fan_out) in dims:
        key, kw, kb = jax.random.split(key, 3)
        bound = 1.0 / math.sqrt(fan_in)
        w = jax.random.uniform(kw, (fan_in, fan_out), jnp.float32, -bound, bound)
        b = jax.random.uniform(kb, (1, fan_out), jnp.float32, -bound, bound)
        params += [w, b]
    return tuple(params)


def actor_ref(x, params):
    """Pure-JAX reference for correctness checking."""
    w1, b1, w2, b2, w3, b3 = params
    h = jnp.maximum(x @ w1 + b1, 0.0)
    h = jnp.maximum(h @ w2 + b2, 0.0)
    return jnp.tanh(h @ w3 + b3)


if __name__ == "__main__":
    dim_observation = 24
    dim_action = 8

    key = jax.random.PRNGKey(0)
    key, kx1, kx2 = jax.random.split(key, 3)
    params = init_actor_params(key, dim_observation, dim_action)
    d_in = dim_observation + dim_action

    x = jax.random.normal(kx1, (8, d_in), jnp.float32)
    ref = actor_ref(x, params)

    # --- default bf16 MXU path (f32 accumulation / bias / ReLU / tanh) ---
    padded_bf16, d_out = prepare_params(params)              # bf16 by default
    out = jax.block_until_ready(actor_forward(x, padded_bf16, d_out))
    assert out.shape == (8, dim_action)
    assert jnp.allclose(out, ref, atol=5e-2, rtol=5e-2), "bf16 path mismatch"

    # --- f32 path (bit-faithful to the PyTorch module) ---
    padded_f32, _ = prepare_params(params, dot_dtype=jnp.float32)
    out_f32 = jax.block_until_ready(actor_forward(x, padded_f32, d_out))
    assert out_f32.shape == (8, dim_action)
    assert jnp.allclose(out_f32, ref, atol=1e-5, rtol=1e-5), "f32 path mismatch"

    # --- ragged batch (not a multiple of the tile / sublane count) ---
    x2 = jax.random.normal(kx2, (20, d_in), jnp.float32)
    out2 = jax.block_until_ready(actor_forward(x2, padded_bf16, d_out))
    ref2 = actor_ref(x2, params)
    assert out2.shape == (20, dim_action)
    assert jnp.allclose(out2, ref2, atol=5e-2, rtol=5e-2), "ragged batch mismatch"

    print("KERNEL_OK")
</pallas_src>

<mosaic_0001>
module attributes {stable_mosaic.version = 11 : i64} {
  func.func @actor_kernel(%arg0: i32, %arg1: memref<8x32xf32, #tpu.memory_space<vmem>>, %arg2: memref<32x512xbf16, #tpu.memory_space<vmem>>, %arg3: memref<1x512xf32, #tpu.memory_space<vmem>>, %arg4: memref<512x128xbf16, #tpu.memory_space<vmem>>, %arg5: memref<1x128xf32, #tpu.memory_space<vmem>>, %arg6: memref<128x128xbf16, #tpu.memory_space<vmem>>, %arg7: memref<1x128xf32, #tpu.memory_space<vmem>>, %arg8: memref<8x128xf32, #tpu.memory_space<vmem>>) attributes {dimension_semantics = [#tpu.dimension_semantics<parallel>], iteration_bounds = array<i64: 1>, scalar_prefetch = 0 : i64, scratch_operands = 0 : i64, tpu.core_type = #tpu.core_type<tc>, window_params = [{transform_indices = @transform_0, window_bounds = array<i64: 8, 32>}, {pipeline_mode = #tpu.pipeline_mode<synchronous>, transform_indices = @transform_1, window_bounds = array<i64: 32, 512>}, {pipeline_mode = #tpu.pipeline_mode<synchronous>, transform_indices = @transform_2, window_bounds = array<i64: 1, 512>}, {pipeline_mode = #tpu.pipeline_mode<synchronous>, transform_indices = @transform_3, window_bounds = array<i64: 512, 128>}, {pipeline_mode = #tpu.pipeline_mode<synchronous>, transform_indices = @transform_4, window_bounds = array<i64: 1, 128>}, {pipeline_mode = #tpu.pipeline_mode<synchronous>, transform_indices = @transform_5, window_bounds = array<i64: 128, 128>}, {pipeline_mode = #tpu.pipeline_mode<synchronous>, transform_indices = @transform_6, window_bounds = array<i64: 1, 128>}, {transform_indices = @transform_7, window_bounds = array<i64: 8, 128>}]} {
    %c0 = arith.constant 0 : index
    %c0_0 = arith.constant 0 : index
    %0 = vector.load %arg1[%c0, %c0_0] : memref<8x32xf32, #tpu.memory_space<vmem>>, vector<8x32xf32>
    %1 = arith.truncf %0 : vector<8x32xf32> to vector<8x32xbf16>
    %c0_1 = arith.constant 0 : index
    %c0_2 = arith.constant 0 : index
    %2 = vector.load %arg2[%c0_1, %c0_2] : memref<32x512xbf16, #tpu.memory_space<vmem>>, vector<32x512xbf16>
    %cst = arith.constant dense<0.000000e+00> : vector<8x512xf32>
    %3 = tpu.matmul %1, %2, %cst {dimension_numbers = #tpu.dot_dimension_numbers<[1], [0], [0], [1], [0, 0, 1, 1], [], []>} : vector<8x32xbf16>, vector<32x512xbf16>, vector<8x512xf32> -> vector<8x512xf32>
    %c0_3 = arith.constant 0 : index
    %c0_4 = arith.constant 0 : index
    %4 = vector.load %arg3[%c0_3, %c0_4] : memref<1x512xf32, #tpu.memory_space<vmem>>, vector<1x512xf32>
    %5 = vector.broadcast %4 : vector<1x512xf32> to vector<8x512xf32>
    %6 = arith.addf %3, %5 : vector<8x512xf32>
    %cst_5 = arith.constant 0.000000e+00 : f32
    %7 = vector.broadcast %cst_5 : f32 to vector<8x512xf32>
    %8 = arith.maximumf %6, %7 : vector<8x512xf32>
    %9 = arith.truncf %8 : vector<8x512xf32> to vector<8x512xbf16>
    %c0_6 = arith.constant 0 : index
    %c0_7 = arith.constant 0 : index
    %10 = vector.load %arg4[%c0_6, %c0_7] : memref<512x128xbf16, #tpu.memory_space<vmem>>, vector<512x128xbf16>
    %cst_8 = arith.constant dense<0.000000e+00> : vector<8x128xf32>
    %11 = tpu.matmul %9, %10, %cst_8 {dimension_numbers = #tpu.dot_dimension_numbers<[1], [0], [0], [1], [0, 0, 1, 1], [], []>} : vector<8x512xbf16>, vector<512x128xbf16>, vector<8x128xf32> -> vector<8x128xf32>
    %c0_9 = arith.constant 0 : index
    %c0_10 = arith.constant 0 : index
    %12 = vector.load %arg5[%c0_9, %c0_10] : memref<1x128xf32, #tpu.memory_space<vmem>>, vector<1x128xf32>
    %13 = vector.broadcast %12 : vector<1x128xf32> to vector<8x128xf32>
    %14 = arith.addf %11, %13 : vector<8x128xf32>
    %cst_11 = arith.constant 0.000000e+00 : f32
    %15 = vector.broadcast %cst_11 : f32 to vector<8x128xf32>
    %16 = arith.maximumf %14, %15 : vector<8x128xf32>
    %17 = arith.truncf %16 : vector<8x128xf32> to vector<8x128xbf16>
    %c0_12 = arith.constant 0 : index
    %c0_13 = arith.constant 0 : index
    %18 = vector.load %arg6[%c0_12, %c0_13] : memref<128x128xbf16, #tpu.memory_space<vmem>>, vector<128x128xbf16>
    %cst_14 = arith.constant dense<0.000000e+00> : vector<8x128xf32>
    %19 = tpu.matmul %17, %18, %cst_14 {dimension_numbers = #tpu.dot_dimension_numbers<[1], [0], [0], [1], [0, 0, 1, 1], [], []>} : vector<8x128xbf16>, vector<128x128xbf16>, vector<8x128xf32> -> vector<8x128xf32>
    %c0_15 = arith.constant 0 : index
    %c0_16 = arith.constant 0 : index
    %20 = vector.load %arg7[%c0_15, %c0_16] : memref<1x128xf32, #tpu.memory_space<vmem>>, vector<1x128xf32>
    %21 = vector.broadcast %20 : vector<1x128xf32> to vector<8x128xf32>
    %22 = arith.addf %19, %21 : vector<8x128xf32>
    %23 = math.tanh %22 : vector<8x128xf32>
    %c0_17 = arith.constant 0 : index
    %c0_18 = arith.constant 0 : index
    %24 = vector.load %arg8[%c0_17, %c0_18] : memref<8x128xf32, #tpu.memory_space<vmem>>, vector<8x128xf32>
    tpu.vector_store %arg8[%c0_17, %c0_18], %23 {strides = array<i32>} : memref<8x128xf32, #tpu.memory_space<vmem>>, vector<8x128xf32>,
    return
  }
  func.func @transform_0(%arg0: i32) -> (i32, i32) {
    %c0_i32 = arith.constant 0 : i32
    %c0_i32_0 = arith.constant 0 : i32
    return %arg0, %c0_i32 : i32, i32
  }
  func.func @transform_1(%arg0: i32) -> (i32, i32) {
    %c0_i32 = arith.constant 0 : i32
    %c0_i32_0 = arith.constant 0 : i32
    %c0_i32_1 = arith.constant 0 : i32
    return %c0_i32, %c0_i32_0 : i32, i32
  }
  func.func @transform_2(%arg0: i32) -> (i32, i32) {
    %c0_i32 = arith.constant 0 : i32
    %c0_i32_0 = arith.constant 0 : i32
    %c0_i32_1 = arith.constant 0 : i32
    return %c0_i32, %c0_i32_0 : i32, i32
  }
  func.func @transform_3(%arg0: i32) -> (i32, i32) {
    %c0_i32 = arith.constant 0 : i32
    %c0_i32_0 = arith.constant 0 : i32
    %c0_i32_1 = arith.constant 0 : i32
    return %c0_i32, %c0_i32_0 : i32, i32
  }
  func.func @transform_4(%arg0: i32) -> (i32, i32) {
    %c0_i32 = arith.constant 0 : i32
    %c0_i32_0 = arith.constant 0 : i32
    %c0_i32_1 = arith.constant 0 : i32
    return %c0_i32, %c0_i32_0 : i32, i32
  }
  func.func @transform_5(%arg0: i32) -> (i32, i32) {
    %c0_i32 = arith.constant 0 : i32
    %c0_i32_0 = arith.constant 0 : i32
    %c0_i32_1 = arith.constant 0 : i32
    return %c0_i32, %c0_i32_0 : i32, i32
  }
  func.func @transform_6(%arg0: i32) -> (i32, i32) {
    %c0_i32 = arith.constant 0 : i32
    %c0_i32_0 = arith.constant 0 : i32
    %c0_i32_1 = arith.constant 0 : i32
    return %c0_i32, %c0_i32_0 : i32, i32
  }
  func.func @transform_7(%arg0: i32) -> (i32, i32) {
    %c0_i32 = arith.constant 0 : i32
    %c0_i32_0 = arith.constant 0 : i32
    return %arg0, %c0_i32 : i32, i32
  }
}

</mosaic_0001>

<bundles_post_ra>
// kernel: tpu_custom_call.1
= control target key start
LH: loop header
LB: loop body
LE: loop exit
PB: predicated region body
PF: predicated region fallthrough
CT: control target
= control target key end

     0   :  { %12 = vsyncpa [#allocation3], 0  ;;  %s1138_s0 = inlined_call_operand.hbm [shape: f32[8,32], index: 0, kind: input, shape index: {}]   ;;  %s1139_s1 = inlined_call_operand.hbm [shape: bf16[32,512], index: 1, kind: input, shape index: {}]   ;;  %s1140_s2 = inlined_call_operand.hbm [shape: f32[1,512], index: 2, kind: input, shape index: {}]   ;;  %s1141_s3 = inlined_call_operand.hbm [shape: bf16[512,128], index: 3, kind: input, shape index: {}]   ;;  %s1142_s4 = inlined_call_operand.vmem [shape: f32[1,128], index: 4, kind: input, shape index: {}]   ;;  %s1143_s5 = inlined_call_operand.hbm [shape: bf16[128,128], index: 5, kind: input, shape index: {}]   ;;  %s1144_s6 = inlined_call_operand.vmem [shape: f32[1,128], index: 6, kind: input, shape index: {}]   ;;  %s1145_s7 = inlined_call_operand.hbm [shape: f32[8,128], index: 7, kind: output, shape index: {}]  }
   0x1   :  { %13 = vsyncpa [#allocation6], 0 }
   0x2   :  { %14 = vsyncpa [#allocation9], 0 }
   0x3   :  { %15 = vsyncpa [#allocation4], 0  ;;  %s1053_s24 = smov [#allocation5]  }
   0x4   :  { %s31_s25 = sshll.u32 %s1053_s24, 4  ;;  %s32_s25 = int_to_ptr.vmem [resolvable:$true] %s31_s25 }
   0x5   :  { %s933_s26 = scalar_lea.vmem %s32_s25, 1024  ;;  %p938_p1 = scmp.lt.s32.totalorder %s32_s25, %s32_s25 }
   0x6   :  { %p934_p0 = scmp.ne.s32.totalorder %s32_s25, %s933_s26  ;;  %p939_p2 = scmp.lt.s32.totalorder %s933_s26, %s933_s26 }
   0x8   :  { %p940_p3 = por %p939_p2, %p938_p1 }
   0xa   :  { %p941_p4 = pnand %p940_p3, %p934_p0 }
   0xc   :  { %944 = shalt.err (!%p941_p4)
}
   0xd   :  { %s1054_s27 = smov 256   ;;  %s1055_s28 = smov 16  }
   0xe   :  { %37 = dma.hbm_to_vmem [thread:$0]  %s1139_s1, 1024, %s32_s25, [#allocation6], %s1054_s27, %s1054_s27, %s1055_s28  }
   0xf   :  { %s1056_s8 = smov [#allocation8]  }
  0x10   :  { %s53_s9 = sshll.u32 %s1056_s8, 4  ;;  %s54_s9 = int_to_ptr.vmem [resolvable:$true] %s53_s9 }
  0x11   :  { %s953_s10 = scalar_lea.vmem %s54_s9, 4096  ;;  %p958_p6 = scmp.lt.s32.totalorder %s54_s9, %s54_s9 }
  0x12   :  { %p954_p5 = scmp.ne.s32.totalorder %s54_s9, %s953_s10  ;;  %p959_p7 = scmp.lt.s32.totalorder %s953_s10, %s953_s10 }
  0x14   :  { %p960_p8 = por %p959_p7, %p958_p6 }
  0x16   :  { %p961_p9 = pnand %p960_p8, %p954_p5 }
  0x18   :  { %964 = shalt.err (!%p961_p9)
}
  0x19   :  { %s1057_s11 = smov 64   ;;  %s1058_s12 = smov 4  }
  0x1a   :  { %59 = dma.hbm_to_vmem [thread:$0]  %s1141_s3, 4096, %s54_s9, [#allocation9], %s1057_s11, %s1057_s11, %s1058_s12  }
  0x1b   :  { %s1059_s1 = smov [#allocation2]   ;;  %s1060_s16 = smov [#allocation7]  }
  0x1c   :  { %s22_s15 = sshll.u32 %s1059_s1, 4  ;;  %s44_s17 = sshll.u32 %s1060_s16, 4  ;;  %s23_s15 = int_to_ptr.vmem [resolvable:$true] %s22_s15  ;;  %s45_s17 = int_to_ptr.vmem [resolvable:$true] %s44_s17 }
  0x1d   :  { %s973_s18 = scalar_lea.vmem %s23_s15, 128  ;;  %p978_p11 = scmp.lt.s32.totalorder %s23_s15, %s23_s15 }
  0x1e   :  { %p974_p10 = scmp.ne.s32.totalorder %s23_s15, %s973_s18  ;;  %p979_p12 = scmp.lt.s32.totalorder %s973_s18, %s973_s18 }
  0x20   :  { %p980_p13 = por %p979_p12, %p978_p11 }
  0x22   :  { %p981_p0 = pnand %p980_p13, %p974_p10 }
  0x24   :  { %984 = shalt.err (!%p981_p0)
}
  0x25   :  { %25 = dma.hbm_to_vmem [thread:$0]  %s1138_s0, 128, %s23_s15, [#allocation3]  }
  0x26   :  { %s993_s21 = scalar_lea.vmem %s45_s17, 64  ;;  %p998_p2 = scmp.lt.s32.totalorder %s45_s17, %s45_s17 }
  0x27   :  { %p994_p1 = scmp.ne.s32.totalorder %s45_s17, %s993_s21  ;;  %p999_p3 = scmp.lt.s32.totalorder %s993_s21, %s993_s21 }
  0x29   :  { %p1000_p4 = por %p999_p3, %p998_p2 }
  0x2b   :  { %p1001_p5 = pnand %p1000_p4, %p994_p1 }
  0x2d   :  { %1004 = shalt.err (!%p1001_p5)
}
  0x2e   :  { %47 = dma.hbm_to_vmem [thread:$0]  %s1140_s2, 64, %s45_s17, [#allocation6]  }
  0x2f   :  { %s1061_s23 = smov [#allocation10]  }
  0x30   :  { %s67_s24 = sshll.u32 %s1061_s23, 4  ;;  %s68_s24 = int_to_ptr.vmem [resolvable:$true] %s67_s24 }
  0x31   :  { %s1013_s25 = scalar_lea.vmem %s68_s24, 1024  ;;  %p1018_p7 = scmp.lt.s32.totalorder %s68_s24, %s68_s24 }
  0x32   :  { %p1014_p6 = scmp.ne.s32.totalorder %s68_s24, %s1013_s25  ;;  %p1019_p8 = scmp.lt.s32.totalorder %s1013_s25, %s1013_s25 }
  0x34   :  { %p1020_p9 = por %p1019_p8, %p1018_p7 }
  0x36   :  { %p1021_p10 = pnand %p1020_p9, %p1014_p6 }
  0x38   :  { %1024 = shalt.err (!%p1021_p10)
}
  0x39   :  { %73 = dma.hbm_to_vmem [thread:$0]  %s1143_s5, 1024, %s68_s24, [#allocation9], %s1057_s11, %s1057_s11, %s1058_s12  }
  0x3a   :  { %1045 = dma.done.wait [#allocation3], 128  }
  0x3b   :  { %1046 = vsyncadd [#allocation3], 4294967168 }
  0x3c   :  { %1047 = dma.done.wait [#allocation6], 1088  }
  0x3d   :  { %1048 = vsyncadd [#allocation6], 4294966208 }
  0x3e   :  { %1049 = dma.done.wait [#allocation9], 5120  }
  0x3f   :  { %1050 = vsyncadd [#allocation9], 4294962176  ;;  %v1062_v0 = vmov 0   ;;  %v871_v1 = vld [vmem:[#allocation5 + $0x24] ss:$16 sps:$4 sm:$0xff]   ;;  %v92_v5 = vld [vmem:[#allocation2] sm:$0xff]  ;;  %v104_v44 = vlaneseq }
  0x40   :  { %200 = vmatprep.mubr.bf16.mxu1 %v1062_v0  ;;  %v873_v2 = vld [vmem:[#allocation5 + $0x20] ss:$16 sps:$4 sm:$0xff]   ;;  %180 = vmatprep.subr.bf16.mxu1 %v871_v1  ;;  %v874_v3 = vld [vmem:[#allocation5 + $0x4] ss:$16 sps:$4 sm:$0xff]   ;;  %v879_v6 = vld [vmem:[#allocation5 + $0x2c] ss:$16 sps:$4 sm:$0xff]   ;;  %v93_v8 = vpack.c.bf16 %v92_v5, %v92_v5 }
  0x41   :  { %v876_v4 = vld [vmem:[#allocation5] ss:$16 sps:$4 sm:$0xff]   ;;  %181 = vmatpush1.bf16.msra.mxu1 %v873_v2  ;;  %v877_v7 = vld [vmem:[#allocation5 + $0x28] ss:$16 sps:$4 sm:$0xff]   ;;  %v882_v9 = vld [vmem:[#allocation5 + $0xc] ss:$16 sps:$4 sm:$0xff]  }
  0x42   :  { %182 = vmatprep.subr.bf16.mxu1 %v874_v3  ;;  %v883_v10 = vld [vmem:[#allocation8 + $0x78] sm:$0xff]   ;;  %vm164_vm0 = vcmask 261120   ;;  %v885_v12 = vld [vmem:[#allocation8 + $0x70] sm:$0xff]   ;;  %v887_v14 = vld [vmem:[#allocation8 + $0x68] sm:$0xff]   ;;  %v1063_v43 = vmov 0.0   ;;  %v105_v45 = vshrl.u32 %v104_v44, 7 }
  0x43   :  { %v884_v11 = vld [vmem:[#allocation8 + $0x38] sm:$0xff]   ;;  %785 = vmatprep.subr.bf16.mxu0 %v883_v10  ;;  %v886_v13 = vld [vmem:[#allocation8 + $0x30] sm:$0xff]   ;;  %v889_v17 = vld [vmem:[#allocation8 + $0x28] sm:$0xff]   ;;  %vm1064_vm1 = vmmov 0  }
  0x44   :  { %786 = vmatpush3.bf16.msra.mxu0 %v884_v11  ;;  %v880_v15 = vld [vmem:[#allocation5 + $0x8] ss:$16 sps:$4 sm:$0xff]   ;;  %v888_v16 = vld [vmem:[#allocation8 + $0xf8] sm:$0xff]   ;;  %v896_v24 = vld [vmem:[#allocation8 + $0xe8] sm:$0xff]   ;;  %v106_v46 = vsub.s32 0, %v105_v45  ;;  %v110_v48 = vsub.s32 1, %v105_v45 }
  0x45   :  { %183 = vmatpush1.bf16.msra.mxu1 %v876_v4  ;;  %787 = vmatprep.subr.bf16.mxu0 %v885_v12  ;;  %v891_v18 = vld [vmem:[#allocation8 + $0x60] sm:$0xff]   ;;  %v890_v19 = vld [vmem:[#allocation8 + $0xb8] sm:$0xff]   ;;  %v892_v20 = vld [vmem:[#allocation8 + $0xf0] sm:$0xff]   ;;  %v114_v53 = vsub.s32 2, %v105_v45  ;;  %v118_v56 = vsub.s32 3, %v105_v45 }
  0x46   :  { %221 = vmatprep.subr.bf16.mxu1 %v879_v6  ;;  %v893_v21 = vld [vmem:[#allocation8 + $0x20] sm:$0xff]   ;;  %v895_v22 = vld [vmem:[#allocation8 + $0x58] sm:$0xff]   ;;  %v894_v23 = vld [vmem:[#allocation8 + $0xb0] sm:$0xff]  }
  0x47   :  { %v897_v25 = vld [vmem:[#allocation8 + $0x18] sm:$0xff]   ;;  %v899_v26 = vld [vmem:[#allocation8 + $0x50] sm:$0xff]   ;;  %v898_v27 = vld [vmem:[#allocation8 + $0xa8] sm:$0xff]  }
  0x48   :  { %741 = vmatmul.mubr.msk.bf16.vlgmr.msra.gmra.mxu1 %vm164_vm0, %v93_v8  ;;  %788 = vmatpush3.bf16.msra.mxu0 %v886_v13  ;;  %v900_v28 = vld [vmem:[#allocation8 + $0xe0] sm:$0xff]   ;;  %v901_v29 = vld [vmem:[#allocation8 + $0x10] sm:$0xff]   ;;  %v903_v31 = vld [vmem:[#allocation8 + $0x48] sm:$0xff]  }
  0x49   :  { %222 = vmatpush1.bf16.msra.mxu1 %v877_v7  ;;  %241 = vmatprep.mubr.bf16.mxu1 %v1062_v0  ;;  %v902_v30 = vld [vmem:[#allocation8 + $0xa0] sm:$0xff]   ;;  %v904_v32 = vld [vmem:[#allocation8 + $0xd8] sm:$0xff]   ;;  %v905_v33 = vld [vmem:[#allocation8 + $0x8] sm:$0xff]  }
  0x4a   :  { %223 = vmatprep.subr.bf16.mxu1 %v882_v9  ;;  %789 = vmatprep.subr.bf16.mxu0 %v887_v14  ;;  %v906_v34 = vld [vmem:[#allocation8 + $0x98] sm:$0xff]   ;;  %v907_v35 = vld [vmem:[#allocation8 + $0x40] sm:$0xff]   ;;  %v908_v36 = vld [vmem:[#allocation8 + $0xd0] sm:$0xff]  }
  0x4b   :  { %v909_v37 = vld [vmem:[#allocation8] sm:$0xff]   ;;  %v910_v38 = vld [vmem:[#allocation8 + $0x90] sm:$0xff]   ;;  %v911_v39 = vld [vmem:[#allocation8 + $0xc8] sm:$0xff]  }
  0x4c   :  { %790 = vmatpush3.bf16.msra.mxu0 %v889_v17  ;;  %v912_v40 = vld [vmem:[#allocation8 + $0x88] sm:$0xff]   ;;  %v913_v41 = vld [vmem:[#allocation8 + $0xc0] sm:$0xff]   ;;  %v102_v47 = vld [vmem:[#allocation7] sm:$0xf] }
  0x4d   :  { %224 = vmatpush1.bf16.msra.mxu1 %v880_v15  ;;  %791 = vmatprep.subr.bf16.mxu0 %v891_v18  ;;  %v914_v42 = vld [vmem:[#allocation8 + $0x80] sm:$0xff]   ;;  %v107_v49 = vrot.slane %v102_v47, %v106_v46  ;;  %v111_v50 = vrot.slane %v102_v47, %v110_v48  ;;  %v115_v59 = vrot.slane %v102_v47, %v114_v53  ;;  %v915_v0 = vld [vmem:[#allocation10 + $0x38] sm:$0xff]   ;;  %v916_v6 = vld [vmem:[#allocation10 + $0x30] sm:$0xff]  }
  0x4e   :  { %807 = vmatprep.subr.bf16.mxu1 %v888_v16  ;;  %v119_v63 = vrot.slane %v102_v47, %v118_v56  ;;  %v917_v12 = vld [vmem:[#allocation10 + $0x28] sm:$0xff]   ;;  %v918_v14 = vld [vmem:[#allocation10 + $0x20] sm:$0xff]   ;;  %v919_v15 = vld [vmem:[#allocation10 + $0x18] sm:$0xff]  }
  0x4f   :  { %v920_v16 = vld [vmem:[#allocation10 + $0x10] sm:$0xff]   ;;  %v921_v17 = vld [vmem:[#allocation10 + $0x8] sm:$0xff]   ;;  %v922_v18 = vld [vmem:[#allocation10] sm:$0xff]  }
  0x50   :  { %742 = vmatmul.mubr.msk.bf16.vlgmr.msra.gmra.mxu1 %vm164_vm0, %v93_v8  ;;  %792 = vmatpush3.bf16.msra.mxu0 %v893_v21 }
  0x51   :  { %808 = vmatpush3.bf16.msra.mxu1 %v890_v19  ;;  %793 = vmatprep.subr.bf16.mxu0 %v895_v22 }
  0x52   :  { %809 = vmatprep.subr.bf16.mxu1 %v892_v20 }
  0x54   :  { %794 = vmatpush3.bf16.msra.mxu0 %v897_v25 }
  0x55   :  { %810 = vmatpush3.bf16.msra.mxu1 %v894_v23  ;;  %795 = vmatprep.subr.bf16.mxu0 %v899_v26 }
  0x56   :  { %811 = vmatprep.subr.bf16.mxu1 %v896_v24  ;;  %v743_v24 = vld [vmem:[%s1142_s4] ss:$0 sm:$0xff]  ;;  %s1065_s4 = smov [#allocation11]  }
  0x57   :  { %s722_s29 = sshll.u32 %s1065_s4, 4  ;;  %s723_s29 = int_to_ptr.vmem [resolvable:$true] %s722_s29 }
  0x58   :  { %796 = vmatpush3.bf16.msra.mxu0 %v901_v29  ;;  %s1025_s30 = scalar_lea.vmem %s723_s29, 128  ;;  %p1030_p12 = scmp.lt.s32.totalorder %s723_s29, %s723_s29 }
  0x59   :  { %812 = vmatpush3.bf16.msra.mxu1 %v898_v27  ;;  %797 = vmatprep.subr.bf16.mxu0 %v903_v31  ;;  %p1026_p11 = scmp.ne.s32.totalorder %s723_s29, %s1025_s30  ;;  %p1031_p13 = scmp.lt.s32.totalorder %s1025_s30, %s1025_s30 }
  0x5a   :  { %813 = vmatprep.subr.bf16.mxu1 %v900_v28 }
  0x5b   :  { %p1032_p0 = por %p1031_p13, %p1030_p12 }
  0x5c   :  { %798 = vmatpush3.bf16.msra.mxu0 %v905_v33 }
  0x5d   :  { %814 = vmatpush3.bf16.msra.mxu1 %v902_v30  ;;  %799 = vmatprep.subr.bf16.mxu0 %v907_v35  ;;  %p1033_p1 = pnand %p1032_p0, %p1026_p11 }
  0x5e   :  { %815 = vmatprep.subr.bf16.mxu1 %v904_v32 }
  0x60   :  { %800 = vmatpush3.bf16.msra.mxu0 %v909_v37 }
  0x61   :  { %816 = vmatpush3.bf16.msra.mxu1 %v906_v34  ;;  %838 = vmatprep.subr.bf16.mxu0 %v1063_v43  ;;  %v776_v34 = vld [vmem:[%s1144_s6] ss:$0 sm:$0xff] }
  0x62   :  { %817 = vmatprep.subr.bf16.mxu1 %v908_v36 }
  0x65   :  { %818 = vmatpush3.bf16.msra.mxu1 %v910_v38 }
  0x66   :  { %819 = vmatprep.subr.bf16.mxu1 %v911_v39 }
  0x69   :  { %820 = vmatpush3.bf16.msra.mxu1 %v912_v40 }
  0x6a   :  { %821 = vmatprep.subr.bf16.mxu1 %v913_v41 }
  0x6d   :  { %822 = vmatpush3.bf16.msra.mxu1 %v914_v42 }
 0x108   :  { %v202_v51 = vpop.f32.mrf.mxu1 }
 0x109   :  { %v203_v52 = vadd.f32 %v202_v51, %v107_v49 }
 0x10a   :  { %v204_v54 = vpop.f32.mrf.mxu1 }
 0x10b   :  { %v205_v55 = vadd.f32 %v204_v54, %v111_v50  ;;  %v250_v57 = vmax.f32 %v203_v52, 0.0 }
 0x10c   :  { %v206_v58 = vpop.f32.mrf.mxu1 }
 0x10d   :  { %v251_v60 = vmax.f32 %v205_v55, 0.0  ;;  %v254_v1 = vpack.c.bf16 %v250_v57, %v250_v57 }
 0x10e   :  { %v207_v61 = vpop.f32.mrf.mxu1 }
 0x10f   :  { %v255_v62 = vpack.c.bf16 %v251_v60, %v251_v60 }
 0x110   :  { %v243_v2 = vpop.f32.mrf.mxu1 }
 0x111   :  { %v244_v3 = vadd.f32 %v243_v2, %v115_v59  ;;  %553 = vmatprep.mubr.bf16.mxu0 %v255_v62 }
 0x112   :  { %v245_v4 = vpop.f32.mrf.mxu1  ;;  %554 = vmatmul.mubr.bf16.vlgmr.msra.gmra.mxu0 %v254_v1 }
 0x113   :  { %v246_v5 = vadd.f32 %v245_v4, %v119_v63  ;;  %839 = vmatpush3.bf16.msra.mxu0 %v915_v0  ;;  %v252_v7 = vmax.f32 %v244_v3, 0.0  ;;  %854 = vmatprep.mubr.msk.bf16.mxu0 %vm1064_vm1, %v1063_v43 }
 0x114   :  { %v247_v8 = vpop.f32.mrf.mxu1  ;;  %840 = vmatprep.subr.bf16.mxu0 %v1063_v43 }
 0x115   :  { %v253_v9 = vmax.f32 %v246_v5, 0.0  ;;  %v256_v13 = vpack.c.bf16 %v252_v7, %v252_v7 }
 0x116   :  { %v248_v10 = vpop.f32.mrf.mxu1 }
 0x117   :  { %v257_v11 = vpack.c.bf16 %v253_v9, %v253_v9  ;;  %841 = vmatpush3.bf16.msra.mxu0 %v916_v6 }
 0x118   :  { %842 = vmatprep.subr.bf16.mxu0 %v1063_v43 }
 0x119   :  { %593 = vmatprep.mubr.bf16.mxu1 %v257_v11 }
 0x11a   :  { %594 = vmatmul.mubr.bf16.vlgmr.msra.gmra.mxu1 %v256_v13 }
 0x11b   :  { %843 = vmatpush3.bf16.msra.mxu0 %v917_v12 }
 0x11c   :  { %844 = vmatprep.subr.bf16.mxu0 %v1063_v43 }
 0x11f   :  { %845 = vmatpush3.bf16.msra.mxu0 %v918_v14 }
 0x120   :  { %846 = vmatprep.subr.bf16.mxu0 %v1063_v43 }
 0x123   :  { %847 = vmatpush3.bf16.msra.mxu0 %v919_v15 }
 0x124   :  { %848 = vmatprep.subr.bf16.mxu0 %v1063_v43 }
 0x127   :  { %849 = vmatpush3.bf16.msra.mxu0 %v920_v16 }
 0x128   :  { %850 = vmatprep.subr.bf16.mxu0 %v1063_v43 }
 0x12b   :  { %851 = vmatpush3.bf16.msra.mxu0 %v921_v17 }
 0x12c   :  { %852 = vmatprep.subr.bf16.mxu0 %v1063_v43 }
 0x12f   :  { %853 = vmatpush3.bf16.msra.mxu0 %v922_v18 }
 0x1d2   :  { %v801_v19 = vpop.f32.mrf.mxu0 }
 0x1d4   :  { %v802_v20 = vpop.f32.mrf.mxu0 }
 0x1d5   :  { %v803_v23 = vadd.f32 %v802_v20, %v801_v19 }
 0x1d6   :  { %v804_v21 = vpop.f32.mrf.mxu0 }
 0x1d7   :  { %v556_v27 = vadd.f32 %v803_v23, %v743_v24 }
 0x1d8   :  { %v805_v22 = vpop.f32.mrf.mxu0 }
 0x1da   :  { %v823_v25 = vpop.f32.mrf.mxu1 }
 0x1dc   :  { %v824_v26 = vpop.f32.mrf.mxu1 }
 0x1dd   :  { %v825_v28 = vadd.f32 %v824_v26, %v823_v25 }
 0x1de   :  { %v826_v29 = vpop.f32.mrf.mxu1 }
 0x1df   :  { %v596_v30 = vadd.f32 %v825_v28, %v556_v27 }
 0x1e0   :  { %v827_v31 = vpop.f32.mrf.mxu1 }
 0x1e1   :  { %v601_v32 = vmax.f32 %v596_v30, 0.0 }
 0x1e3   :  { %v602_v33 = vpack.c.bf16 %v601_v32, %v601_v32 }
 0x1e5   :  { %855 = vmatmul.mubr.bf16.vlgmr.msra.gmra.mxu0 %v602_v33 }
 0x2a5   :  { %v708_v35 = vpop.f32.mrf.mxu0 }
 0x2a6   :  { %v709_v36 = vadd.f32 %v776_v34, %v708_v35 }
 0x2a7   :  { %v856_v37 = vpop.f32.mrf.mxu0 }
 0x2a8   :  { %923 = vtanh.f32 %v709_v36 }
 0x2a9   :  { %v711_v38 = vpop.f32.mrf.mxu0 }
 0x2ab   :  { %v857_v39 = vpop.f32.mrf.mxu0 }
 0x2b5   :  { %v924_v40 = vpop.eup %923 }
 0x2b6   :  { %715 = vst [vmem:[#allocation11] sm:$0xff] %v924_v40 }
 0x2b7   :  { %1036 = shalt.err (!%p1033_p1)
}
 0x2b8   :  { %725 = dma.vmem_to_hbm [thread:$0]  %s723_s29, 128, %s1145_s7, [#allocation4]  }
 0x2b9   :  { %1051 = dma.done.wait [#allocation4], 128  }
 0x2ba   :  { %1052 = vsyncadd [#allocation4], 4294967168 }
 0x2bb   :  { %729 = vsyncpa [#allocation3], 1 }
 0x2bc   :  { %730 = vsyncpa [#allocation6], 1 }
 0x2bd   :  { %731 = vsyncpa [#allocation9], 1 }
 0x2be   :  { %732 = vsyncpa [#allocation4], 1 }

</bundles_post_ra>
